<compile_context>
chip_gen: v6e
topology: v6e:2x2x1
jax: 0.10.0
libtpu: 0.0.40
codegen_flags: <defaults>
</compile_context>

<pallas_src>
import functools

import jax
import jax.numpy as jnp
from jax import lax
from jax.experimental import pallas as pl
from jax.experimental.pallas import tpu as pltpu

BETA = 100.0
EPSILON = 1e-8

LANES = 128
SUBLANES = 8
NUM_CORES = 2                          # v7x has 2 TCs; serial (harmless) on v5e/v6e
TARGET_BLOCK_BYTES = 2 * 1024 * 1024   # ~2 MiB per input block per buffer


def _sqrt_loss_kernel(x_ref, t_ref, o_ref, acc_ref, *,
                      total, row_tile, n_full_blocks, beta_eps):
    k = pl.program_id(1)
    steps = pl.num_programs(1)
    blk = pl.program_id(0) * steps + k          # logical block id over all rows

    @pl.when(k == 0)
    def _():
        acc_ref[...] = jnp.zeros_like(acc_ref)

    n_slices = row_tile // SUBLANES

    def block_sum(masked):
        # Fold the (row_tile, 128) block into one (8,128) vreg of partial sums
        # via a bounded-live-range loop over (8,128) slices (VPU adds only; the
        # cross-lane reduce happens once, in the wrapper).
        def body(s, acc):
            r = pl.multiple_of(s * SUBLANES, SUBLANES)
            x = x_ref[pl.ds(r, SUBLANES), :].astype(jnp.float32)
            t = t_ref[pl.ds(r, SUBLANES), :].astype(jnp.float32)
            val = jnp.sqrt(jnp.abs(t - x) + beta_eps)
            if masked:
                row = (blk * row_tile + r
                       + lax.broadcasted_iota(jnp.int32, (SUBLANES, LANES), 0))
                lane = lax.broadcasted_iota(jnp.int32, (SUBLANES, LANES), 1)
                val = jnp.where(row * LANES + lane < total, val, 0.0)
            return acc + val

        return lax.fori_loop(0, n_slices, body,
                             jnp.zeros((SUBLANES, LANES), jnp.float32),
                             unroll=min(8, n_slices))

    # Only the block(s) containing flat indices >= total pay the masking cost.
    is_tail = blk >= n_full_blocks

    @pl.when(jnp.logical_not(is_tail))
    def _():
        acc_ref[...] += block_sum(masked=False)

    @pl.when(is_tail)
    def _():
        acc_ref[...] += block_sum(masked=True)

    @pl.when(k == steps - 1)
    def _():
        o_ref[0] = acc_ref[...]


def sqrt_loss(inputs, targets, *, beta=BETA, epsilon=EPSILON):
    assert inputs.shape == targets.shape
    total = int(inputs.size)
    # int32 flat-index mask headroom (one extra tile of slack).
    assert 0 < total < 2 ** 31 - 2 ** 22

    flat_x = inputs.reshape(-1)
    flat_t = targets.reshape(-1)

    # Lane-dense (rows, 128) slab in native dtype (cast happens in-kernel).
    # Pad only up to the next multiple of 8*128 elements, and only if needed;
    # the padded / ragged tail is masked inside the kernel (no correction).
    chunk = SUBLANES * LANES
    padded = pl.cdiv(total, chunk) * chunk
    if padded != total:
        flat_x = jnp.pad(flat_x, (0, padded - total))
        flat_t = jnp.pad(flat_t, (0, padded - total))
    rows = padded // LANES
    x2 = flat_x.reshape(rows, LANES)
    t2 = flat_t.reshape(rows, LANES)

    # Row tile sized by bytes: ~2 MiB per block regardless of input dtype.
    itemsize = jnp.dtype(inputs.dtype).itemsize
    max_rows = max(SUBLANES,
                   (TARGET_BLOCK_BYTES // (LANES * itemsize)) // SUBLANES * SUBLANES)
    row_tile = min(max_rows, rows)
    n_blocks = pl.cdiv(rows, row_tile)            # blocks touching real data
    steps = pl.cdiv(n_blocks, NUM_CORES)          # per-core reduction steps
    n_full_blocks = total // (row_tile * LANES)   # blocks needing no tail mask

    def in_map(c, k):
        # Clamp so duplicate / overhanging logical blocks still DMA in-bounds;
        # their contribution is zeroed by the in-kernel flat-index mask.
        return (jnp.minimum(c * steps + k, n_blocks - 1), 0)

    kernel = functools.partial(
        _sqrt_loss_kernel, total=total, row_tile=row_tile,
        n_full_blocks=n_full_blocks, beta_eps=float(beta) * float(epsilon))

    cost = pl.CostEstimate(
        flops=4 * total,
        transcendentals=total,
        bytes_accessed=2 * total * itemsize + NUM_CORES * SUBLANES * LANES * 4)

    partials = pl.pallas_call(
        kernel,
        out_shape=jax.ShapeDtypeStruct((NUM_CORES, SUBLANES, LANES), jnp.float32),
        grid_spec=pltpu.PrefetchScalarGridSpec(
            num_scalar_prefetch=0,
            grid=(NUM_CORES, steps),
            in_specs=[pl.BlockSpec((row_tile, LANES), in_map),
                      pl.BlockSpec((row_tile, LANES), in_map)],
            out_specs=pl.BlockSpec((1, SUBLANES, LANES), lambda c, k: (c, 0, 0)),
            scratch_shapes=[pltpu.VMEM((SUBLANES, LANES), jnp.float32)],
        ),
        compiler_params=pltpu.CompilerParams(
            dimension_semantics=("parallel", "arbitrary"),
            vmem_limit_bytes=32 * 1024 * 1024,
        ),
        cost_estimate=cost,
    )(x2, t2)

    # Final tiny reduce (NUM_CORES*8*128 partials) + scale; one small XLA fusion.
    scale = (float(beta) ** 0.5) / float(total)
    return jnp.sum(partials) * scale


if __name__ == "__main__":
    key = jax.random.PRNGKey(0)
    k1, k2 = jax.random.split(key)
    shape = (2, 4, 16, 16)
    inputs = jax.random.normal(k1, shape, dtype=jnp.float32)
    targets = jax.random.normal(k2, shape, dtype=jnp.float32)

    loss = sqrt_loss(inputs, targets)
    jax.block_until_ready(loss)

    # Reference check in plain JAX (original, un-folded formula).
    err = targets - inputs
    ref = jnp.mean(BETA * jnp.sqrt(jnp.abs(err) / BETA + EPSILON))
    assert jnp.allclose(loss, ref, rtol=1e-5, atol=1e-6), (loss, ref)

    print("KERNEL_OK")
</pallas_src>

<mosaic_0001>
module attributes {stable_mosaic.version = 11 : i64} {
  func.func @_sqrt_loss_kernel(%arg0: i32, %arg1: i32, %arg2: memref<16x128xf32, #tpu.memory_space<vmem>>, %arg3: memref<16x128xf32, #tpu.memory_space<vmem>>, %arg4: memref<1x8x128xf32, #tpu.memory_space<vmem>>, %arg5: memref<8x128xf32, #tpu.memory_space<vmem>>) attributes {dimension_semantics = [#tpu.dimension_semantics<parallel>, #tpu.dimension_semantics<arbitrary>], iteration_bounds = array<i64: 2, 1>, scalar_prefetch = 0 : i64, scratch_operands = 1 : i64, tpu.core_type = #tpu.core_type<tc>, window_params = [{transform_indices = @transform_0, window_bounds = array<i64: 16, 128>}, {transform_indices = @transform_1, window_bounds = array<i64: 16, 128>}, {transform_indices = @transform_2, window_bounds = array<i64: 1, 8, 128>}]} {
    %c1_i32 = arith.constant 1 : i32
    %0 = arith.muli %arg0, %c1_i32 : i32
    %1 = arith.addi %0, %arg1 : i32
    %c0_i32 = arith.constant 0 : i32
    %2 = arith.cmpi eq, %arg1, %c0_i32 : i32
    %3 = arith.extui %2 : i1 to i32
    %c0_i32_0 = arith.constant 0 : i32
    %4 = arith.cmpi ne, %3, %c0_i32_0 : i32
    scf.if %4 {
      %cst = arith.constant 0.000000e+00 : f32
      %14 = vector.broadcast %cst : f32 to vector<8x128xf32>
      %c0 = arith.constant 0 : index
      %c0_6 = arith.constant 0 : index
      %15 = vector.load %arg5[%c0, %c0_6] : memref<8x128xf32, #tpu.memory_space<vmem>>, vector<8x128xf32>
      tpu.vector_store %arg5[%c0, %c0_6], %14 {strides = array<i32>} : memref<8x128xf32, #tpu.memory_space<vmem>>, vector<8x128xf32>,
    } else {
    }
    %c1_i32_1 = arith.constant 1 : i32
    %5 = arith.cmpi sge, %1, %c1_i32_1 : i32
    %true = arith.constant true
    %6 = arith.xori %5, %true : i1
    %7 = arith.extui %6 : i1 to i32
    %c0_i32_2 = arith.constant 0 : i32
    %8 = arith.cmpi ne, %7, %c0_i32_2 : i32
    scf.if %8 {
      %c0 = arith.constant 0 : index
      %c0_6 = arith.constant 0 : index
      %14 = vector.load %arg5[%c0, %c0_6] : memref<8x128xf32, #tpu.memory_space<vmem>>, vector<8x128xf32>
      %cst = arith.constant 0.000000e+00 : f32
      %15 = vector.broadcast %cst : f32 to vector<8x128xf32>
      %c0_i32_7 = arith.constant 0 : i32
      %c8_i32 = arith.constant 8 : i32
      %16 = arith.muli %c0_i32_7, %c8_i32 : i32
      %17 = tpu.assume_multiple %16, 8 : i32
      %18 = arith.index_cast %17 : i32 to index
      %c0_8 = arith.constant 0 : index
      %19 = vector.load %arg2[%18, %c0_8] : memref<16x128xf32, #tpu.memory_space<vmem>>, vector<8x128xf32>
      %20 = arith.index_cast %17 : i32 to index
      %c0_9 = arith.constant 0 : index
      %21 = vector.load %arg3[%20, %c0_9] : memref<16x128xf32, #tpu.memory_space<vmem>>, vector<8x128xf32>
      %22 = arith.subf %21, %19 : vector<8x128xf32>
      %23 = math.absf %22 : vector<8x128xf32>
      %cst_10 = arith.constant 9.99999997E-7 : f32
      %24 = vector.broadcast %cst_10 : f32 to vector<8x128xf32>
      %25 = arith.addf %23, %24 : vector<8x128xf32>
      %26 = math.sqrt %25 : vector<8x128xf32>
      %27 = arith.addf %15, %26 : vector<8x128xf32>
      %c1_i32_11 = arith.constant 1 : i32
      %c8_i32_12 = arith.constant 8 : i32
      %28 = arith.muli %c1_i32_11, %c8_i32_12 : i32
      %29 = tpu.assume_multiple %28, 8 : i32
      %30 = arith.index_cast %29 : i32 to index
      %c0_13 = arith.constant 0 : index
      %31 = vector.load %arg2[%30, %c0_13] : memref<16x128xf32, #tpu.memory_space<vmem>>, vector<8x128xf32>
      %32 = arith.index_cast %29 : i32 to index
      %c0_14 = arith.constant 0 : index
      %33 = vector.load %arg3[%32, %c0_14] : memref<16x128xf32, #tpu.memory_space<vmem>>, vector<8x128xf32>
      %34 = arith.subf %33, %31 : vector<8x128xf32>
      %35 = math.absf %34 : vector<8x128xf32>
      %cst_15 = arith.constant 9.99999997E-7 : f32
      %36 = vector.broadcast %cst_15 : f32 to vector<8x128xf32>
      %37 = arith.addf %35, %36 : vector<8x128xf32>
      %38 = math.sqrt %37 : vector<8x128xf32>
      %39 = arith.addf %27, %38 : vector<8x128xf32>
      %c2_i32 = arith.constant 2 : i32
      %40 = arith.addf %14, %39 : vector<8x128xf32>
      %c0_16 = arith.constant 0 : index
      %c0_17 = arith.constant 0 : index
      %41 = vector.load %arg5[%c0_16, %c0_17] : memref<8x128xf32, #tpu.memory_space<vmem>>, vector<8x128xf32>
      tpu.vector_store %arg5[%c0_16, %c0_17], %40 {strides = array<i32>} : memref<8x128xf32, #tpu.memory_space<vmem>>, vector<8x128xf32>,
    } else {
    }
    %9 = arith.extui %5 : i1 to i32
    %c0_i32_3 = arith.constant 0 : i32
    %10 = arith.cmpi ne, %9, %c0_i32_3 : i32
    scf.if %10 {
      %c0 = arith.constant 0 : index
      %c0_6 = arith.constant 0 : index
      %14 = vector.load %arg5[%c0, %c0_6] : memref<8x128xf32, #tpu.memory_space<vmem>>, vector<8x128xf32>
      %cst = arith.constant 0.000000e+00 : f32
      %15 = vector.broadcast %cst : f32 to vector<8x128xf32>
      %c0_i32_7 = arith.constant 0 : i32
      %c8_i32 = arith.constant 8 : i32
      %16 = arith.muli %c0_i32_7, %c8_i32 : i32
      %17 = tpu.assume_multiple %16, 8 : i32
      %18 = arith.index_cast %17 : i32 to index
      %c0_8 = arith.constant 0 : index
      %19 = vector.load %arg2[%18, %c0_8] : memref<16x128xf32, #tpu.memory_space<vmem>>, vector<8x128xf32>
      %20 = arith.index_cast %17 : i32 to index
      %c0_9 = arith.constant 0 : index
      %21 = vector.load %arg3[%20, %c0_9] : memref<16x128xf32, #tpu.memory_space<vmem>>, vector<8x128xf32>
      %22 = arith.subf %21, %19 : vector<8x128xf32>
      %23 = math.absf %22 : vector<8x128xf32>
      %cst_10 = arith.constant 9.99999997E-7 : f32
      %24 = vector.broadcast %cst_10 : f32 to vector<8x128xf32>
      %25 = arith.addf %23, %24 : vector<8x128xf32>
      %26 = math.sqrt %25 : vector<8x128xf32>
      %c16_i32 = arith.constant 16 : i32
      %27 = arith.muli %1, %c16_i32 : i32
      %28 = arith.addi %27, %17 : i32
      %29 = tpu.iota {dimensions = array<i32: 0>} : vector<8x128xi32>
      %30 = vector.broadcast %28 : i32 to vector<8x128xi32>
      %31 = arith.addi %30, %29 : vector<8x128xi32>
      %32 = tpu.iota {dimensions = array<i32: 1>} : vector<8x128xi32>
      %c128_i32 = arith.constant 128 : i32
      %33 = vector.broadcast %c128_i32 : i32 to vector<8x128xi32>
      %34 = arith.muli %31, %33 : vector<8x128xi32>
      %35 = arith.addi %34, %32 : vector<8x128xi32>
      %c2048_i32 = arith.constant 2048 : i32
      %36 = vector.broadcast %c2048_i32 : i32 to vector<8x128xi32>
      %37 = arith.cmpi slt, %35, %36 : vector<8x128xi32>
      %cst_11 = arith.constant 0.000000e+00 : f32
      %38 = vector.broadcast %cst_11 : f32 to vector<8x128xf32>
      %39 = arith.select %37, %26, %38 : vector<8x128xi1>, vector<8x128xf32>
      %40 = arith.addf %15, %39 : vector<8x128xf32>
      %c1_i32_12 = arith.constant 1 : i32
      %c8_i32_13 = arith.constant 8 : i32
      %41 = arith.muli %c1_i32_12, %c8_i32_13 : i32
      %42 = tpu.assume_multiple %41, 8 : i32
      %43 = arith.index_cast %42 : i32 to index
      %c0_14 = arith.constant 0 : index
      %44 = vector.load %arg2[%43, %c0_14] : memref<16x128xf32, #tpu.memory_space<vmem>>, vector<8x128xf32>
      %45 = arith.index_cast %42 : i32 to index
      %c0_15 = arith.constant 0 : index
      %46 = vector.load %arg3[%45, %c0_15] : memref<16x128xf32, #tpu.memory_space<vmem>>, vector<8x128xf32>
      %47 = arith.subf %46, %44 : vector<8x128xf32>
      %48 = math.absf %47 : vector<8x128xf32>
      %cst_16 = arith.constant 9.99999997E-7 : f32
      %49 = vector.broadcast %cst_16 : f32 to vector<8x128xf32>
      %50 = arith.addf %48, %49 : vector<8x128xf32>
      %51 = math.sqrt %50 : vector<8x128xf32>
      %c16_i32_17 = arith.constant 16 : i32
      %52 = arith.muli %1, %c16_i32_17 : i32
      %53 = arith.addi %52, %42 : i32
      %54 = tpu.iota {dimensions = array<i32: 0>} : vector<8x128xi32>
      %55 = vector.broadcast %53 : i32 to vector<8x128xi32>
      %56 = arith.addi %55, %54 : vector<8x128xi32>
      %57 = tpu.iota {dimensions = array<i32: 1>} : vector<8x128xi32>
      %c128_i32_18 = arith.constant 128 : i32
      %58 = vector.broadcast %c128_i32_18 : i32 to vector<8x128xi32>
      %59 = arith.muli %56, %58 : vector<8x128xi32>
      %60 = arith.addi %59, %57 : vector<8x128xi32>
      %c2048_i32_19 = arith.constant 2048 : i32
      %61 = vector.broadcast %c2048_i32_19 : i32 to vector<8x128xi32>
      %62 = arith.cmpi slt, %60, %61 : vector<8x128xi32>
      %cst_20 = arith.constant 0.000000e+00 : f32
      %63 = vector.broadcast %cst_20 : f32 to vector<8x128xf32>
      %64 = arith.select %62, %51, %63 : vector<8x128xi1>, vector<8x128xf32>
      %65 = arith.addf %40, %64 : vector<8x128xf32>
      %c2_i32 = arith.constant 2 : i32
      %66 = arith.addf %14, %65 : vector<8x128xf32>
      %c0_21 = arith.constant 0 : index
      %c0_22 = arith.constant 0 : index
      %67 = vector.load %arg5[%c0_21, %c0_22] : memref<8x128xf32, #tpu.memory_space<vmem>>, vector<8x128xf32>
      tpu.vector_store %arg5[%c0_21, %c0_22], %66 {strides = array<i32>} : memref<8x128xf32, #tpu.memory_space<vmem>>, vector<8x128xf32>,
    } else {
    }
    %c0_i32_4 = arith.constant 0 : i32
    %11 = arith.cmpi eq, %arg1, %c0_i32_4 : i32
    %12 = arith.extui %11 : i1 to i32
    %c0_i32_5 = arith.constant 0 : i32
    %13 = arith.cmpi ne, %12, %c0_i32_5 : i32
    scf.if %13 {
      %c0 = arith.constant 0 : index
      %c0_6 = arith.constant 0 : index
      %14 = vector.load %arg5[%c0, %c0_6] : memref<8x128xf32, #tpu.memory_space<vmem>>, vector<8x128xf32>
      %c0_7 = arith.constant 0 : index
      %c0_8 = arith.constant 0 : index
      %c0_9 = arith.constant 0 : index
      %15 = vector.load %arg4[%c0_7, %c0_8, %c0_9] : memref<1x8x128xf32, #tpu.memory_space<vmem>>, vector<1x8x128xf32>
      %16 = vector.shape_cast %15 : vector<1x8x128xf32> to vector<8x128xf32>
      %17 = vector.shape_cast %14 : vector<8x128xf32> to vector<1x8x128xf32>
      tpu.vector_store %arg4[%c0_7, %c0_8, %c0_9], %17 {strides = array<i32>} : memref<1x8x128xf32, #tpu.memory_space<vmem>>, vector<1x8x128xf32>,
    } else {
    }
    return
  }
  func.func @transform_0(%arg0: i32, %arg1: i32) -> (i32, i32) {
    %c1_i32 = arith.constant 1 : i32
    %0 = arith.muli %arg0, %c1_i32 : i32
    %1 = arith.addi %0, %arg1 : i32
    %c0_i32 = arith.constant 0 : i32
    %2 = arith.minsi %1, %c0_i32 : i32
    %c0_i32_0 = arith.constant 0 : i32
    %c0_i32_1 = arith.constant 0 : i32
    return %2, %c0_i32_0 : i32, i32
  }
  func.func @transform_1(%arg0: i32, %arg1: i32) -> (i32, i32) {
    %c1_i32 = arith.constant 1 : i32
    %0 = arith.muli %arg0, %c1_i32 : i32
    %1 = arith.addi %0, %arg1 : i32
    %c0_i32 = arith.constant 0 : i32
    %2 = arith.minsi %1, %c0_i32 : i32
    %c0_i32_0 = arith.constant 0 : i32
    %c0_i32_1 = arith.constant 0 : i32
    return %2, %c0_i32_0 : i32, i32
  }
  func.func @transform_2(%arg0: i32, %arg1: i32) -> (i32, i32, i32) {
    %c0_i32 = arith.constant 0 : i32
    %c0_i32_0 = arith.constant 0 : i32
    %c0_i32_1 = arith.constant 0 : i32
    return %arg0, %c0_i32, %c0_i32_0 : i32, i32, i32
  }
}

</mosaic_0001>

<bundles_post_ra>
// kernel: tpu_custom_call.1
= control target key start
LH: loop header
LB: loop body
LE: loop exit
PB: predicated region body
PF: predicated region fallthrough
CT: control target
= control target key end

     0   :  { %7 = vsyncpa [#allocation4], 0  ;;  %s972_s0 = inlined_call_operand.hbm [shape: f32[16,128], index: 0, kind: input, shape index: {}]   ;;  %s973_s1 = inlined_call_operand.hbm [shape: f32[16,128], index: 1, kind: input, shape index: {}]   ;;  %s974_s2 = inlined_call_operand.hbm [shape: f32[2,8,128], index: 2, kind: output, shape index: {}]  }
   0x1   :  { %9 = vsyncpa [#allocation4 + $0x1], 0 }
   0x2   :  { %10 = vsyncpa [#allocation7], 0 }
   0x3   :  { %12 = vsyncpa [#allocation7 + $0x1], 0 }
   0x4   :  { %13 = vsyncpa [#allocation5], 0 }
   0x5   :  { %15 = vsyncpa [#allocation5 + $0x1], 0  ;;  %s768_s9 = smov 0   ;;  %s770_s10 = smov 0  }
   0x6   :  { %s772_s11 = smov 0   ;;  %s774_s12 = smov 0  }
   0x7   :  { %s776_s13 = smov 0   ;;  %s778_s14 = smov 0  }
   0x8   :  { %s780_s15 = smov 0   ;;  %s782_s16 = smov 0  }
   0x9 LB: > { %s455_s17 = sadd.s32 4294967295, %s745_s16   ;;  %s456_s18 = sadd.s32 4294967294, %s745_s16   ;;  %s745_s16 = sphi %s782_s16, %s21_s16   ;;  %s741_s15 = sphi %s780_s15, %s993_s15   ;;  %s737_s14 = sphi %s778_s14, %s992_s14   ;;  %s733_s13 = sphi %s776_s13, %s962_s13   ;;  %s729_s12 = sphi %s774_s12, %s991_s12   ;;  %s725_s11 = sphi %s772_s11, %s990_s11   ;;  %s721_s10 = sphi %s770_s10, %s989_s10   ;;  %s717_s9 = sphi %s768_s9, %s988_s9  }
   0xa   : > { %s33_s19 = sadd.s32 1, %s741_s15  ;;  %p714_p1 = scmp.ne.s32.totalorder %s733_s13, 0 }
   0xb   : > { %p35_p0 = scmp.ge.s32.totalorder %s33_s19, 2  ;;  %p54_p2 = scmp.eq.s32.totalorder %s745_s16, 0 }
   0xc   : > { %p59_p3 = scmp.ne.s32.totalorder %s733_s13, %s729_s12  ;;  %p60_p5 = scmp.eq.s32.totalorder %s455_s17, 0 }
   0xd   : > { %s995_s19 = smov (%p35_p0, %s33_s19), 0  ;;  %p814_p4 = por %p714_p1, %p54_p2 }
   0xe   : > { %p818_p6 = por %p60_p5, %p59_p3  ;;  %s101_s22 = ssub.s32 %s741_s15, %s995_s19 }
   0xf   : > { %p102_p7 = scmp.eq.s32.totalorder %s101_s22, 0  ;;  %s104_s23 = sadd.s32 1, %s725_s11 }
  0x10   : > { %s978_s21 = scalar_select %p818_p6, 1, 0 }
  0x11   : > { %s826_s24 = scalar_select %p102_p7, %s725_s11, %s104_s23  }
  0x12   : > { %p114_p8 = scmp.ne.s32.totalorder %s725_s11, %s721_s10  ;;  %p115_p9 = scmp.eq.s32.totalorder %s455_s17, 1 }
  0x13   : > { %p120_p10 = scmp.ne.s32.totalorder %s721_s10, %s717_s9  ;;  %p121_p11 = scmp.eq.s32.totalorder %s456_s18, 1 }
  0x14   : > { %p832_p12 = por %p115_p9, %p114_p8  ;;  %p499_p1 = scmp.lt.s32.totalorder %s745_s16, 2 }
  0x15   : > { %p837_p0 = por %p121_p11, %p120_p10  ;;  %s747_s27 = smov [#allocation3]  }
  0x16   : > { %s979_s25 = scalar_select %p832_p12, 1, 0 }
  0x17   : > { %s980_s26 = scalar_select %p837_p0, 1, 0 }
  0x18   : > { %s155_s28 = sshll.u32 %s747_s27, 4  ;;  %p844_p2 = pnand %p499_p1, %p814_p4  ;;  %s156_s28 = int_to_ptr.vmem [resolvable:$true] %s155_s28 }
  0x19   : > { %s584_s4 = scalar_lea.hbm %s972_s0, 256 }
  0x1a   : > { %p585_p3 = scmp.ne.s32.totalorder %s972_s0, %s584_s4  ;;  %p586_p5 = pneg %p844_p2 }
  0x1b   : > { %p591_p8 = scmp.lt.s32.totalorder %s584_s4, %s584_s4 }
  0x1c   : > { %p587_p7 = pnand %p586_p5, %p585_p3 }
  0x1e   : > { %p588_p4 = pneg %p587_p7 }
  0x20   : > { %p593_p9 = pnand %p591_p8, %p588_p4 }
  0x22   : > { %596 = shalt.err (!%p593_p9)
}
  0x23   : > { %s597_s7 = scalar_lea.vmem %s156_s28, 256  ;;  %s604_s8 = scalar_lea.vmem %s156_s28, 512 }
  0x24   : > { %p598_p10 = scmp.ne.s32.totalorder %s156_s28, %s597_s7  ;;  %p605_p13 = scmp.lt.s32.totalorder %s156_s28, %s156_s28 }
  0x25   : > { %p606_p0 = scmp.lt.s32.totalorder %s604_s8, %s597_s7 }
  0x26   : > { %p600_p11 = pnand %p598_p10, %p586_p5 }
  0x27   : > { %p607_p12 = por %p606_p0, %p605_p13 }
  0x28   : > { %p601_p1 = pneg %p600_p11 }
  0x2a   : > { %p608_p6 = pnand %p607_p12, %p601_p1 }
  0x2c   : > { %611 = shalt.err (!%p608_p6)
}
  0x2d   : > { %s748_s12 = smov 128   ;;  %s749_s17 = smov 8  }
  0x2e   : > { %491 = dma.hbm_to_vmem [thread:$0]  (!%p844_p2), %s972_s0, 256, %s156_s28, [#allocation4], %s748_s12, %s748_s12, %s749_s17  }
  0x2f   : > { %p465_p3 = scmp.ge.s32.totalorder %s745_s16, 1  ;;  %p187_p7 = scmp.lt.s32.totalorder %s745_s16, 3 }
  0x30   : > { %s750_s23 = smov [#allocation6]   ;;  %s612_s4 = scalar_lea.hbm %s973_s1, 256 }
  0x31   : > { %p869_p4 = pnand %p465_p3, %p187_p7  ;;  %s179_s27 = sshll.u32 %s750_s23, 4  ;;  %s180_s27 = int_to_ptr.vmem [resolvable:$true] %s179_s27 }
  0x32   : > { %p613_p6 = scmp.ne.s32.totalorder %s973_s1, %s612_s4  ;;  %p619_p0 = scmp.lt.s32.totalorder %s612_s4, %s612_s4 }
  0x33   : > { %s982_s22 = scalar_select %p869_p4, 1, 0 }
  0x34   : > { %p615_p12 = pnand %p613_p6, %p586_p5 }
  0x36   : > { %p616_p13 = pneg %p615_p12 }
  0x38   : > { %p621_p8 = pnand %p619_p0, %p616_p13 }
  0x3a   : > { %624 = shalt.err (!%p621_p8)
}
  0x3b   : > { %s625_s28 = scalar_lea.vmem %s180_s27, 256  ;;  %s632_s7 = scalar_lea.vmem %s180_s27, 512 }
  0x3c   : > { %p626_p9 = scmp.ne.s32.totalorder %s180_s27, %s625_s28  ;;  %p633_p1 = scmp.lt.s32.totalorder %s180_s27, %s180_s27 }
  0x3d   : > { %p634_p3 = scmp.lt.s32.totalorder %s632_s7, %s625_s28 }
  0x3e   : > { %p628_p10 = pnand %p626_p9, %p586_p5 }
  0x3f   : > { %p635_p7 = por %p634_p3, %p633_p1 }
  0x40   : > { %p629_p11 = pneg %p628_p10 }
  0x42   : > { %p636_p4 = pnand %p635_p7, %p629_p11 }
  0x44   : > { %639 = shalt.err (!%p636_p4)
}
  0x45   : > { %494 = dma.hbm_to_vmem [thread:$0]  (!%p844_p2), %s973_s1, 256, %s180_s27, [#allocation7], %s748_s12, %s748_s12, %s749_s17  }
  0x46   : > { %p983_p6 = scmp.ne.s32.totalorder %s982_s22, 0 }
  0x47   : > { %s193_s20 = sand.u32 (!%p983_p6), 1, %s733_s13   ;;  %p984_p5 = scmp.ne.s32.totalorder (!%p983_p6), %s978_s21, 0 }
  0x48   : > { %191 = sbr.rel (%p983_p6) target bundleno = 183 (0xb7), region = 28  ;;  %s466_s23 = sshll.u32 (!%p983_p6), %s193_s20, 4 }
  0x49   : > { %s194_s30 = scalar_lea.sflag (!%p983_p6), [#allocation4], %s193_s20  ;;  %s893_s3 = scalar_lea.vmem (!%p983_p6), [#allocation3], %s466_s23 }
  0x4d   : > { %703 = dma.done.wait (%p984_p5), %s194_s30, 256  }
  0x4e   : > { %705 = vsyncadd (%p984_p5), %s194_s30, 4294967040  ;;  %s203_s29 = scalar_lea.sflag [#allocation7], %s193_s20  ;;  %s899_s4 = scalar_lea.vmem [#allocation6], %s466_s23 }
  0x4f   : > { %707 = dma.done.wait (%p984_p5), %s203_s29, 256  }
  0x50   : > { %709 = vsyncadd (%p984_p5), %s203_s29, 4294967040  ;;  %s229_s12 = sand.u32 1, %s721_s10   ;;  %v751_v0 = vmov 0.0   ;;  %p469_p2 = scmp.ge.s32.totalorder %s737_s14, 1 }
  0x51   : > { %s908_s17 = sshll.u32 %s229_s12, 3  ;;  %245 = vst [vmem:[#allocation2] sm:$0xff] %v751_v0 }
  0x52   : > { %s231_s22 = scalar_lea.vmem [#allocation8], %s908_s17  ;;  %250 = sbr.rel (%p469_p2) target bundleno = 119 (0x77), region = 44 }
  0x57   : > { %v252_v1 = vld [vmem:[%s893_s3] sm:$0xff]  ;;  %v470_v4 = vld [vmem:[%s893_s3 + $0x8] sm:$0xff] }
  0x58   : > { %v253_v2 = vld [vmem:[%s899_s4] sm:$0xff]  ;;  %v471_v5 = vld [vmem:[%s899_s4 + $0x8] sm:$0xff] }
  0x59   : > { %v254_v3 = vsub.f32 %v253_v2, %v252_v1  ;;  %v269_v6 = vsub.f32 %v471_v5, %v470_v4  ;;  %v251_v20 = vld [vmem:[#allocation2] sm:$0xff] }
  0x5b   : > { %v255_v7 = vand.u32 2147483647, %v254_v3  ;;  %v270_v8 = vand.u32 2147483647, %v269_v6 }
  0x5d   : > { %v256_v9 = vadd.f32 1e-06, %v255_v7  ;;  %v271_v10 = vadd.f32 1e-06, %v270_v8 }
  0x5f   : > { %576 = vrsqrt.f32 %v256_v9  ;;  %vm259_vm0 = vcmp.eq.f32.partialorder %v256_v9, inf  ;;  %v262_v12 = vand.u32 2147483648, %v256_v9  ;;  %vm261_vm1 = vcmp.eq.f32.partialorder %v256_v9, 0.0 }
  0x60   : > { %578 = vrsqrt.f32 %v271_v10  ;;  %vm274_vm2 = vcmp.eq.f32.partialorder %v271_v10, inf  ;;  %v277_v15 = vand.u32 2147483648, %v271_v10  ;;  %vm276_vm3 = vcmp.eq.f32.partialorder %v271_v10, 0.0 }
  0x6c   : > { %v577_v11 = vpop.eup %576 }
  0x6d   : > { %v579_v13 = vpop.eup %578  ;;  %v258_v14 = vmul.f32 %v577_v11, %v256_v9 }
  0x6e   : > { %v273_v16 = vmul.f32 %v579_v13, %v271_v10 }
  0x6f   : > { %v260_v17 = vsel %vm259_vm0, %v256_v9, %v258_v14 }
  0x70   : > { %v263_v18 = vsel %vm261_vm1, %v262_v12, %v260_v17  ;;  %v275_v19 = vsel %vm274_vm2, %v271_v10, %v273_v16 }
  0x71   : > { %v278_v21 = vsel %vm276_vm3, %v277_v15, %v275_v19 }
  0x72   : > { %v279_v22 = vadd.f32 %v278_v21, %v263_v18 }
  0x74   : > { %v280_v23 = vadd.f32 %v279_v22, %v251_v20 }
  0x76   : > { %281 = vst [vmem:[#allocation2] sm:$0xff] %v280_v23 }
  0x77 PF: > { %p472_p4 = scmp.lt.s32.totalorder %s737_s14, 1 }
  0x78   : > { %s473_s21 = sshll.u32 (!%p472_p4), %s737_s14, 4 }
  0x79   : > { %284 = sbr.rel (%p472_p4) target bundleno = 159 (0x9f), region = 48  ;;  %s325_s27 = sadd.s32 (!%p472_p4), 8, %s473_s21 }
  0x7e   : > { %v286_v24 = vld [vmem:[%s893_s3] sm:$0xff]  ;;  %v474_v27 = vld [vmem:[%s893_s3 + $0x8] sm:$0xff]  ;;  %v300_v29 = vlaneseq  ;;  %v302_v36 = vstv %s473_s21  ;;  %v326_v37 = vstv %s325_s27 }
  0x7f   : > { %v287_v25 = vld [vmem:[%s899_s4] sm:$0xff]  ;;  %v475_v28 = vld [vmem:[%s899_s4 + $0x8] sm:$0xff] }
  0x80   : > { %v288_v26 = vsub.f32 %v287_v25, %v286_v24  ;;  %v315_v30 = vsub.f32 %v475_v28, %v474_v27  ;;  %v301_v34 = vshrl.u32 %v300_v29, 7  ;;  %v305_v40 = vand.u32 127, %v300_v29  ;;  %v285_v56 = vld [vmem:[#allocation2] sm:$0xff] }
  0x82   : > { %v289_v31 = vand.u32 2147483647, %v288_v26  ;;  %v316_v32 = vand.u32 2147483647, %v315_v30  ;;  %v303_v38 = vadd.s32 %v302_v36, %v301_v34  ;;  %v327_v39 = vadd.s32 %v326_v37, %v301_v34 }
  0x84   : > { %v290_v33 = vadd.f32 1e-06, %v289_v31  ;;  %v317_v35 = vadd.f32 1e-06, %v316_v32  ;;  %v306_v41 = vmul.u32 128, %v303_v38  ;;  %v328_v42 = vmul.u32 128, %v327_v39 }
  0x86   : > { %580 = vrsqrt.f32 %v290_v33  ;;  %v307_v43 = vadd.s32 %v306_v41, %v305_v40  ;;  %v329_v44 = vadd.s32 %v328_v42, %v305_v40  ;;  %vm293_vm4 = vcmp.eq.f32.partialorder %v290_v33, inf }
  0x87   : > { %582 = vrsqrt.f32 %v317_v35  ;;  %v296_v46 = vand.u32 2147483648, %v290_v33  ;;  %vm295_vm5 = vcmp.eq.f32.partialorder %v290_v33, 0.0  ;;  %vm320_vm6 = vcmp.eq.f32.partialorder %v317_v35, inf }
  0x88   : > { %v323_v49 = vand.u32 2147483648, %v317_v35  ;;  %vm308_vm7 = vcmp.lt.s32.totalorder %v307_v43, 2048  ;;  %vm322_vm8 = vcmp.eq.f32.partialorder %v317_v35, 0.0  ;;  %vm330_vm9 = vcmp.lt.s32.totalorder %v329_v44, 2048 }
  0x93   : > { %v581_v45 = vpop.eup %580 }
  0x94   : > { %v583_v47 = vpop.eup %582  ;;  %v292_v48 = vmul.f32 %v581_v45, %v290_v33 }
  0x95   : > { %v319_v50 = vmul.f32 %v583_v47, %v317_v35 }
  0x96   : > { %v294_v51 = vsel %vm293_vm4, %v290_v33, %v292_v48 }
  0x97   : > { %v297_v52 = vsel %vm295_vm5, %v296_v46, %v294_v51  ;;  %v321_v53 = vsel %vm320_vm6, %v317_v35, %v319_v50 }
  0x98   : > { %v309_v54 = vsel %vm308_vm7, %v297_v52, 0.0  ;;  %v324_v55 = vsel %vm322_vm8, %v323_v49, %v321_v53 }
  0x99   : > { %v331_v57 = vsel %vm330_vm9, %v324_v55, 0.0 }
  0x9a   : > { %v332_v58 = vadd.f32 %v331_v57, %v309_v54 }
  0x9c   : > { %v333_v59 = vadd.f32 %v332_v58, %v285_v56 }
  0x9e   : > { %334 = vst [vmem:[#allocation2] sm:$0xff] %v333_v59 }
  0x9f PF: > { %s477_s5 = sshll.u32 %s737_s14, 7  ;;  %s354_s8 = sshll.u32 %s231_s22, 4  ;;  %s355_s8 = int_to_ptr.vmem [resolvable:$true] %s354_s8 }
  0xa0   : > { %s352_s7 = scalar_lea.hbm %s974_s2, %s477_s5  ;;  %s341_s18 = scalar_lea.sflag [#allocation5], %s229_s12 }
  0xa1   : > { %s640_s20 = scalar_lea.vmem %s355_s8, 128  ;;  %p985_p13 = scmp.ne.s32.totalorder %s979_s25, 0 }
  0xa2   : > { %p641_p12 = scmp.ne.s32.totalorder %s355_s8, %s640_s20  ;;  %s752_s23 = smov [#allocation8]  }
  0xa3   : > { %s644_s30 = sshll.u32 %s752_s23, 4  ;;  %s645_s30 = int_to_ptr.vmem [resolvable:$false] %s644_s30 }
  0xa4   : > { %p642_p0 = pnand %p641_p12, %p985_p13  ;;  %s646_s14 = scalar_lea.vmem %s645_s30, 256 }
  0xa5   : > { %v338_v60 = vld [vmem:[#allocation2] sm:$0xff]  ;;  %p647_p9 = scmp.lt.s32.totalorder %s355_s8, %s645_s30  ;;  %p648_p10 = scmp.lt.s32.totalorder %s646_s14, %s640_s20 }
  0xa6   : > { %339 = vst [vmem:[%s231_s22] sm:$0xff] %v338_v60  ;;  %p643_p8 = pneg %p642_p0 }
  0xa7   : > { %p649_p11 = por %p648_p10, %p647_p9 }
  0xa9   : > { %p650_p1 = pnand %p649_p11, %p643_p8 }
  0xab   : > { %653 = shalt.err (!%p650_p1)
}
  0xac   : > { %s654_s3 = scalar_lea.hbm %s352_s7, 128  ;;  %s658_s12 = scalar_lea.hbm %s974_s2, 256 }
  0xad   : > { %p655_p3 = scmp.ne.s32.totalorder %s352_s7, %s654_s3  ;;  %p659_p5 = scmp.lt.s32.totalorder %s352_s7, %s974_s2 }
  0xae   : > { %p660_p2 = scmp.lt.s32.totalorder %s658_s12, %s654_s3 }
  0xaf   : > { %p656_p7 = pnand %p655_p3, %p985_p13 }
  0xb0   : > { %p661_p4 = por %p660_p2, %p659_p5 }
  0xb1   : > { %p657_p6 = pneg %p656_p7 }
  0xb3   : > { %p662_p12 = pnand %p661_p4, %p657_p6 }
  0xb5   : > { %665 = shalt.err (!%p662_p12)
}
  0xb6   : > { %486 = dma.vmem_to_hbm [thread:$0]  (%p985_p13), %s355_s8, 128, %s352_s7, %s341_s18  }
  0xb7 PF: > { %s366_s21 = sand.u32 1, %s717_s9   ;;  %p986_p0 = scmp.ne.s32.totalorder %s980_s26, 0 }
  0xb8   : > { %p987_p8 = scmp.ge.s32.totalorder %s745_s16, 2  ;;  %s367_s27 = scalar_lea.sflag [#allocation5], %s366_s21 }
  0xba   : > { %p496_p9 = pnand %p987_p8, %p986_p0 }
  0xbc   : > { %p497_p10 = pneg %p496_p9 }
  0xbe   : > { %711 = dma.done.wait (%p497_p10), %s367_s27, 128  }
  0xbf   : > { %713 = vsyncadd (%p497_p10), %s367_s27, 4294967168  ;;  %s21_s16 = sadd.s32 1, %s745_s16   ;;  %s988_s9 = smov %s721_s10 }
  0xc0   : > { %p18_p11 = scmp.ge.s32.totalorder %s21_s16, 4   ;;  %s989_s10 = smov %s725_s11 }
  0xc1   : > { %s990_s11 = smov %s826_s24  ;;  %s991_s12 = smov %s733_s13 }
  0xc2   : > { %s962_s13 = smov 0   ;;  %s992_s14 = smov %s741_s15 }
  0xc3   : > { %s993_s15 = smov %s995_s19  ;;  %20 = sbr.rel (!%p18_p11) target bundleno = 9 (0x9), region = 106 }
  0xc8   :  { %372 = vsyncpa [#allocation4], 1 }
  0xc9   :  { %374 = vsyncpa [#allocation4 + $0x1], 1 }
  0xca   :  { %375 = vsyncpa [#allocation7], 1 }
  0xcb   :  { %377 = vsyncpa [#allocation7 + $0x1], 1 }
  0xcc   :  { %378 = vsyncpa [#allocation5], 1 }
  0xcd   :  { %380 = vsyncpa [#allocation5 + $0x1], 1 }

</bundles_post_ra>
